<compile_context>
chip_gen: v7x
topology: tpu7x:2x2x1
jax: 0.10.0
libtpu: 0.0.40
codegen_flags: <defaults>
</compile_context>

<pallas_src>
import functools

import numpy as np
import jax
import jax.numpy as jnp
from jax.experimental import pallas as pl
from jax.experimental.pallas import tpu as pltpu


def _round_up(a, b):
    return ((a + b - 1) // b) * b


# ----------------------------------------------------------------------------
# Hierarchy construction (mirrors HCI_2_add_balanced.__init__)
# ----------------------------------------------------------------------------
def build_balanced_hierarchy(m, n):
    hierarchy = {}
    curr_lay = list(range(n))
    all_lays = []
    while len(curr_lay) > m:
        lcl = len(curr_lay)
        good = lcl // m
        rest = lcl % m
        new_lay = list(range(max(curr_lay) + 1,
                             max(curr_lay) + 1 + good + int(rest != 0)))
        for i, l in enumerate(new_lay):
            hierarchy[l] = curr_lay[i * m:min(i * m + m, lcl)]
        curr_lay = new_lay
        all_lays.append(curr_lay)
    hierarchy[-1] = curr_lay
    all_lays.append([-1])
    return hierarchy, all_lays


def build_hci_params(m, n, seed=0):
    """Deterministic per-node Choquet weights (normalized: >=0, sum to 1)."""
    # TODO(synk): `Choquet_2_add_ATTENTION` source is not provided by the
    # reference; we use a standard normalized (non-negative, sum-to-one)
    # 2-additive Choquet parameterization, initialized deterministically here.
    hierarchy, layers = build_balanced_hierarchy(m, n)
    rng = np.random.RandomState(seed)
    layer_params = []
    width = n
    for lay in layers:
        nodes = []
        for j, _node in enumerate(lay):
            children = list(range(j * m, min((j + 1) * m, width)))
            k = len(children)
            pairs = [(a, b) for ai, a in enumerate(children) for b in children[ai + 1:]]
            n_pair = len(pairs)
            raw = rng.uniform(0.05, 1.0, size=k + 2 * n_pair)
            raw = raw / raw.sum()          # normalize(): capacity weights sum to 1
            nodes.append(dict(children=children,
                              pairs=pairs,
                              w_single=raw[:k],
                              w_min=raw[k:k + n_pair],
                              w_max=raw[k + n_pair:]))
        layer_params.append(dict(width=width, K=len(lay), nodes=nodes))
        width = len(lay)
    return hierarchy, layers, layer_params


def build_layer_matrices(layer_params, n_pad, p_pad):
    """Pack per-layer Choquet weights into padded, pre-folded/fused operands.

    Returns:
      w0   : (n_in, n_pad + p_pad)      fused [W1 | Mdiff] for layer 0 (K = n_in)
      wlat : (L-1, n_pad, n_pad+p_pad)  fused [W1 | Mdiff] for layers 1..L-1
      Wb   : (L, p_pad, n_pad)          |diff| -> node weights
      n_in : leaf-dim (sublane-aligned to 8)
    """
    L = len(layer_params)
    Ws = np.zeros((L, n_pad, n_pad), np.float64)     # singleton weights (child -> node)
    Msum = np.zeros((L, n_pad, p_pad), np.float64)   # pair sum projector
    Mdiff = np.zeros((L, n_pad, p_pad), np.float64)  # pair diff projector
    Wa = np.zeros((L, p_pad, n_pad), np.float64)     # (wmin+wmax)/2, pair -> node
    Wb = np.zeros((L, p_pad, n_pad), np.float64)     # (wmax-wmin)/2, pair -> node
    for l, lp in enumerate(layer_params):
        p_ctr = 0
        for j, nd in enumerate(lp['nodes']):
            for ci, c in enumerate(nd['children']):
                Ws[l, c, j] = nd['w_single'][ci]
            for pi, (c1, c2) in enumerate(nd['pairs']):
                Msum[l, c1, p_ctr] = 1.0
                Msum[l, c2, p_ctr] = 1.0
                Mdiff[l, c1, p_ctr] = 1.0
                Mdiff[l, c2, p_ctr] = -1.0
                Wa[l, p_ctr, j] = 0.5 * (nd['w_min'][pi] + nd['w_max'][pi])
                Wb[l, p_ctr, j] = 0.5 * (nd['w_max'][pi] - nd['w_min'][pi])
                p_ctr += 1
    # Fold the two linear paths into one matrix, then fuse with Mdiff so each
    # layer's two independent projections are a single 256-wide matmul.
    W1 = Ws + np.einsum('lij,ljk->lik', Msum, Wa)
    Wlin = np.concatenate([W1, Mdiff], axis=2)                 # (L, n_pad, n_pad+p_pad)
    n_in = _round_up(max(8, layer_params[0]['width']), 8)      # leaves, sublane-aligned
    w0 = Wlin[0, :n_in, :]
    wlat = Wlin[1:]
    return w0, wlat, Wb, n_in


# ----------------------------------------------------------------------------
# Pallas kernel: all hierarchy layers for one batch tile (2 matmuls / layer)
# ----------------------------------------------------------------------------
def hci_kernel(x_ref, w0_ref, wlat_ref, wb_ref, out_ref, *, num_layers, n_pad):
    snz = None
    acc = None
    for l in range(num_layers):                        # static unroll (L == 3)
        if l == 0:
            # bf16 x bf16, f32 accumulation, contraction over K = n_in (16).
            y = jnp.dot(x_ref[...], w0_ref[...], preferred_element_type=jnp.float32)
        else:
            # f32 activations (weights promoted); compute is not the bottleneck.
            y = jnp.dot(acc, wlat_ref[l - 1], preferred_element_type=jnp.float32)
        lin = y[:, :n_pad]                             # x @ W1
        absd = jnp.abs(y[:, n_pad:])                   # |x @ Mdiff|
        acc = lin + jnp.dot(absd, wb_ref[l], preferred_element_type=jnp.float32)
        if l == 0:
            snz = acc                                  # 'snz' = layer-0 output
    # Single lane-dense (tile_b, n_pad) f32 store: lanes [0:K0] hold snz,
    # lane n_pad-1 holds the root output (last-layer lane 0).
    lane = jax.lax.broadcasted_iota(jnp.int32, snz.shape, 1)
    out_ref[...] = jnp.where(lane == n_pad - 1, acc[:, 0:1], snz)


def pick_tile_b(batch, max_tile=512):
    """Largest tile <= max_tile that still leaves >= 2 grid steps when the batch
    allows it, so both of v7x's TensorCores get work."""
    bp = _round_up(batch, 128)
    half = _round_up((bp + 1) // 2, 128)
    return int(min(max_tile, max(128, half)))


def hci_forward(x, w0, wlat, wb, *, num_layers, tile_b=None):
    """x: (B, n_leaves) f32.  Returns the (B, n_pad) merged output slab."""
    B, n = x.shape
    L, p_pad, n_pad = wb.shape
    n_in, fused = w0.shape
    assert num_layers == L and num_layers >= 2
    assert wlat.shape == (L - 1, n_pad, fused)
    if tile_b is None:
        tile_b = pick_tile_b(B)
    B_pad = _round_up(B, tile_b)
    # Input kept at its native (sublane-aligned) feature width: 8x less HBM read
    # than padding to 128 lanes on the host.
    x_pad = jnp.zeros((B_pad, n_in), jnp.bfloat16).at[:B, :n].set(
        x.astype(jnp.bfloat16))

    kernel = functools.partial(hci_kernel, num_layers=num_layers, n_pad=n_pad)
    # Weights (~230 KiB bf16 total) use constant index_maps -> VMEM-resident
    # across all batch tiles; only x / out stream per grid step.
    out = pl.pallas_call(
        kernel,
        out_shape=jax.ShapeDtypeStruct((B_pad, n_pad), jnp.float32),
        grid=(B_pad // tile_b,),
        in_specs=[
            pl.BlockSpec((tile_b, n_in), lambda i: (i, 0)),             # x tile
            pl.BlockSpec((n_in, fused), lambda i: (0, 0)),              # w0 (resident)
            pl.BlockSpec((L - 1, n_pad, fused), lambda i: (0, 0, 0)),   # wlat (resident)
            pl.BlockSpec((L, p_pad, n_pad), lambda i: (0, 0, 0)),       # wb (resident)
        ],
        out_specs=pl.BlockSpec((tile_b, n_pad), lambda i: (i, 0)),      # merged slab
        compiler_params=pltpu.CompilerParams(
            dimension_semantics=("parallel",)),                         # 2-TC split on v7x
    )(x_pad, w0, wlat, wb)
    return out[:B, :]


# ----------------------------------------------------------------------------
# Pure-numpy reference (mirrors the batched PyTorch forward), float64
# ----------------------------------------------------------------------------
def reference_forward(x, layer_params):
    cur = np.asarray(x, np.float64)
    snz = None
    for l, lp in enumerate(layer_params):
        outs = []
        for nd in lp['nodes']:
            o = cur[:, nd['children']] @ nd['w_single']
            for pi, (c1, c2) in enumerate(nd['pairs']):
                a, b = cur[:, c1], cur[:, c2]
                o = o + nd['w_min'][pi] * np.minimum(a, b) \
                      + nd['w_max'][pi] * np.maximum(a, b)
            outs.append(o)
        cur = np.stack(outs, axis=1)
        if l == 0:
            snz = cur.copy()
    return {'output': cur[:, 0], 'snz': snz}


# ----------------------------------------------------------------------------
if __name__ == "__main__":
    # HCI_2_add_balanced(m=3, n=16): 16 leaves, 3 children per aggregation node.
    m, n, B = 3, 16, 4
    _hierarchy, layers, layer_params = build_hci_params(m, n, seed=0)
    num_layers = len(layers)
    K0 = layer_params[0]['K']

    n_pad = p_pad = 128
    assert K0 < n_pad - 1                      # root lane (n_pad-1) never collides with snz
    W0, Wlat, Wb, n_in = build_layer_matrices(layer_params, n_pad, p_pad)
    w0 = jnp.asarray(W0, jnp.bfloat16)
    wlat = jnp.asarray(Wlat, jnp.bfloat16)
    wb = jnp.asarray(Wb, jnp.bfloat16)

    key = jax.random.PRNGKey(0)
    x = jax.random.uniform(key, (B, n), dtype=jnp.float32)

    # --- small-batch run (single grid step) ---
    slab = hci_forward(x, w0, wlat, wb, num_layers=num_layers)
    jax.block_until_ready(slab)
    result = {'output': np.asarray(slab[:, n_pad - 1], np.float64),   # shape (B,)
              'snz': np.asarray(slab[:, :K0], np.float64)}            # shape (B, K0)
    ref = reference_forward(np.asarray(x), layer_params)
    assert result['output'].shape == (B,)
    assert result['snz'].shape == (B, K0)
    # bf16 weights with f32 activations/accumulation: errors well under 1e-2.
    assert np.allclose(result['output'], ref['output'], atol=2e-2), "output mismatch"
    assert np.allclose(result['snz'], ref['snz'], atol=2e-2), "snz mismatch"

    # --- multi-tile run (exercises the parallel batch grid, 2 grid steps) ---
    B2 = 260
    x2 = jax.random.uniform(jax.random.PRNGKey(1), (B2, n), dtype=jnp.float32)
    slab2 = hci_forward(x2, w0, wlat, wb, num_layers=num_layers)
    jax.block_until_ready(slab2)
    ref2 = reference_forward(np.asarray(x2), layer_params)
    assert np.allclose(np.asarray(slab2[:, n_pad - 1], np.float64), ref2['output'],
                       atol=2e-2), "batched output mismatch"
    assert np.allclose(np.asarray(slab2[:, :K0], np.float64), ref2['snz'],
                       atol=2e-2), "batched snz mismatch"

    print("KERNEL_OK")
</pallas_src>

<mosaic_0001>
module attributes {stable_mosaic.version = 11 : i64} {
  func.func @hci_kernel(%arg0: i32, %arg1: memref<128x16xbf16, #tpu.memory_space<vmem>>, %arg2: memref<16x256xbf16, #tpu.memory_space<vmem>>, %arg3: memref<2x128x256xbf16, #tpu.memory_space<vmem>>, %arg4: memref<3x128x128xbf16, #tpu.memory_space<vmem>>, %arg5: memref<128x128xf32, #tpu.memory_space<vmem>>) attributes {dimension_semantics = [#tpu.dimension_semantics<parallel>], iteration_bounds = array<i64: 1>, scalar_prefetch = 0 : i64, scratch_operands = 0 : i64, tpu.core_type = #tpu.core_type<tc>, window_params = [{transform_indices = @transform_0, window_bounds = array<i64: 128, 16>}, {pipeline_mode = #tpu.pipeline_mode<synchronous>, transform_indices = @transform_1, window_bounds = array<i64: 16, 256>}, {pipeline_mode = #tpu.pipeline_mode<synchronous>, transform_indices = @transform_2, window_bounds = array<i64: 2, 128, 256>}, {pipeline_mode = #tpu.pipeline_mode<synchronous>, transform_indices = @transform_3, window_bounds = array<i64: 3, 128, 128>}, {transform_indices = @transform_4, window_bounds = array<i64: 128, 128>}]} {
    %c0 = arith.constant 0 : index
    %c0_0 = arith.constant 0 : index
    %0 = vector.load %arg1[%c0, %c0_0] : memref<128x16xbf16, #tpu.memory_space<vmem>>, vector<128x16xbf16>
    %c0_1 = arith.constant 0 : index
    %c0_2 = arith.constant 0 : index
    %1 = vector.load %arg2[%c0_1, %c0_2] : memref<16x256xbf16, #tpu.memory_space<vmem>>, vector<16x256xbf16>
    %cst = arith.constant dense<0.000000e+00> : vector<128x256xf32>
    %2 = tpu.matmul %0, %1, %cst {dimension_numbers = #tpu.dot_dimension_numbers<[1], [0], [0], [1], [0, 0, 1, 1], [], []>} : vector<128x16xbf16>, vector<16x256xbf16>, vector<128x256xf32> -> vector<128x256xf32>
    %3 = vector.extract_strided_slice %2 {offsets = [0, 0], sizes = [128, 128], strides = [1, 1]} : vector<128x256xf32> to vector<128x128xf32>
    %4 = vector.extract_strided_slice %2 {offsets = [0, 128], sizes = [128, 128], strides = [1, 1]} : vector<128x256xf32> to vector<128x128xf32>
    %5 = math.absf %4 : vector<128x128xf32>
    %c0_3 = arith.constant 0 : index
    %c0_4 = arith.constant 0 : index
    %c0_5 = arith.constant 0 : index
    %6 = vector.load %arg4[%c0_3, %c0_4, %c0_5] : memref<3x128x128xbf16, #tpu.memory_space<vmem>>, vector<1x128x128xbf16>
    %7 = vector.shape_cast %6 : vector<1x128x128xbf16> to vector<128x128xbf16>
    %cst_6 = arith.constant dense<0.000000e+00> : vector<128x128xf32>
    %8 = tpu.matmul %5, %7, %cst_6 {dimension_numbers = #tpu.dot_dimension_numbers<[1], [0], [0], [1], [0, 0, 1, 1], [], []>} : vector<128x128xf32>, vector<128x128xbf16>, vector<128x128xf32> -> vector<128x128xf32>
    %9 = arith.addf %3, %8 : vector<128x128xf32>
    %c0_7 = arith.constant 0 : index
    %c0_8 = arith.constant 0 : index
    %c0_9 = arith.constant 0 : index
    %10 = vector.load %arg3[%c0_7, %c0_8, %c0_9] : memref<2x128x256xbf16, #tpu.memory_space<vmem>>, vector<1x128x256xbf16>
    %11 = vector.shape_cast %10 : vector<1x128x256xbf16> to vector<128x256xbf16>
    %cst_10 = arith.constant dense<0.000000e+00> : vector<128x256xf32>
    %12 = tpu.matmul %9, %11, %cst_10 {dimension_numbers = #tpu.dot_dimension_numbers<[1], [0], [0], [1], [0, 0, 1, 1], [], []>} : vector<128x128xf32>, vector<128x256xbf16>, vector<128x256xf32> -> vector<128x256xf32>
    %13 = vector.extract_strided_slice %12 {offsets = [0, 0], sizes = [128, 128], strides = [1, 1]} : vector<128x256xf32> to vector<128x128xf32>
    %14 = vector.extract_strided_slice %12 {offsets = [0, 128], sizes = [128, 128], strides = [1, 1]} : vector<128x256xf32> to vector<128x128xf32>
    %15 = math.absf %14 : vector<128x128xf32>
    %c1 = arith.constant 1 : index
    %c0_11 = arith.constant 0 : index
    %c0_12 = arith.constant 0 : index
    %16 = vector.load %arg4[%c1, %c0_11, %c0_12] : memref<3x128x128xbf16, #tpu.memory_space<vmem>>, vector<1x128x128xbf16>
    %17 = vector.shape_cast %16 : vector<1x128x128xbf16> to vector<128x128xbf16>
    %cst_13 = arith.constant dense<0.000000e+00> : vector<128x128xf32>
    %18 = tpu.matmul %15, %17, %cst_13 {dimension_numbers = #tpu.dot_dimension_numbers<[1], [0], [0], [1], [0, 0, 1, 1], [], []>} : vector<128x128xf32>, vector<128x128xbf16>, vector<128x128xf32> -> vector<128x128xf32>
    %19 = arith.addf %13, %18 : vector<128x128xf32>
    %c1_14 = arith.constant 1 : index
    %c0_15 = arith.constant 0 : index
    %c0_16 = arith.constant 0 : index
    %20 = vector.load %arg3[%c1_14, %c0_15, %c0_16] : memref<2x128x256xbf16, #tpu.memory_space<vmem>>, vector<1x128x256xbf16>
    %21 = vector.shape_cast %20 : vector<1x128x256xbf16> to vector<128x256xbf16>
    %cst_17 = arith.constant dense<0.000000e+00> : vector<128x256xf32>
    %22 = tpu.matmul %19, %21, %cst_17 {dimension_numbers = #tpu.dot_dimension_numbers<[1], [0], [0], [1], [0, 0, 1, 1], [], []>} : vector<128x128xf32>, vector<128x256xbf16>, vector<128x256xf32> -> vector<128x256xf32>
    %23 = vector.extract_strided_slice %22 {offsets = [0, 0], sizes = [128, 128], strides = [1, 1]} : vector<128x256xf32> to vector<128x128xf32>
    %24 = vector.extract_strided_slice %22 {offsets = [0, 128], sizes = [128, 128], strides = [1, 1]} : vector<128x256xf32> to vector<128x128xf32>
    %25 = math.absf %24 : vector<128x128xf32>
    %c2 = arith.constant 2 : index
    %c0_18 = arith.constant 0 : index
    %c0_19 = arith.constant 0 : index
    %26 = vector.load %arg4[%c2, %c0_18, %c0_19] : memref<3x128x128xbf16, #tpu.memory_space<vmem>>, vector<1x128x128xbf16>
    %27 = vector.shape_cast %26 : vector<1x128x128xbf16> to vector<128x128xbf16>
    %cst_20 = arith.constant dense<0.000000e+00> : vector<128x128xf32>
    %28 = tpu.matmul %25, %27, %cst_20 {dimension_numbers = #tpu.dot_dimension_numbers<[1], [0], [0], [1], [0, 0, 1, 1], [], []>} : vector<128x128xf32>, vector<128x128xbf16>, vector<128x128xf32> -> vector<128x128xf32>
    %29 = arith.addf %23, %28 : vector<128x128xf32>
    %30 = tpu.iota {dimensions = array<i32: 1>} : vector<128x128xi32>
    %c127_i32 = arith.constant 127 : i32
    %31 = vector.broadcast %c127_i32 : i32 to vector<128x128xi32>
    %32 = arith.cmpi eq, %30, %31 : vector<128x128xi32>
    %33 = vector.extract_strided_slice %29 {offsets = [0, 0], sizes = [128, 1], strides = [1, 1]} : vector<128x128xf32> to vector<128x1xf32>
    %34 = vector.shape_cast %33 : vector<128x1xf32> to vector<128x1xf32>
    %35 = vector.broadcast %34 : vector<128x1xf32> to vector<128x128xf32>
    %36 = arith.select %32, %35, %9 : vector<128x128xi1>, vector<128x128xf32>
    %c0_21 = arith.constant 0 : index
    %c0_22 = arith.constant 0 : index
    %37 = vector.load %arg5[%c0_21, %c0_22] : memref<128x128xf32, #tpu.memory_space<vmem>>, vector<128x128xf32>
    tpu.vector_store %arg5[%c0_21, %c0_22], %36 {strides = array<i32>} : memref<128x128xf32, #tpu.memory_space<vmem>>, vector<128x128xf32>,
    return
  }
  func.func @transform_0(%arg0: i32) -> (i32, i32) {
    %c0_i32 = arith.constant 0 : i32
    %c0_i32_0 = arith.constant 0 : i32
    return %arg0, %c0_i32 : i32, i32
  }
  func.func @transform_1(%arg0: i32) -> (i32, i32) {
    %c0_i32 = arith.constant 0 : i32
    %c0_i32_0 = arith.constant 0 : i32
    %c0_i32_1 = arith.constant 0 : i32
    return %c0_i32, %c0_i32_0 : i32, i32
  }
  func.func @transform_2(%arg0: i32) -> (i32, i32, i32) {
    %c0_i32 = arith.constant 0 : i32
    %c0_i32_0 = arith.constant 0 : i32
    %c0_i32_1 = arith.constant 0 : i32
    %c0_i32_2 = arith.constant 0 : i32
    return %c0_i32, %c0_i32_0, %c0_i32_1 : i32, i32, i32
  }
  func.func @transform_3(%arg0: i32) -> (i32, i32, i32) {
    %c0_i32 = arith.constant 0 : i32
    %c0_i32_0 = arith.constant 0 : i32
    %c0_i32_1 = arith.constant 0 : i32
    %c0_i32_2 = arith.constant 0 : i32
    return %c0_i32, %c0_i32_0, %c0_i32_1 : i32, i32, i32
  }
  func.func @transform_4(%arg0: i32) -> (i32, i32) {
    %c0_i32 = arith.constant 0 : i32
    %c0_i32_0 = arith.constant 0 : i32
    return %arg0, %c0_i32 : i32, i32
  }
}

</mosaic_0001>

<bundles_post_ra>
// kernel: tpu_custom_call.1
= control target key start
LH: loop header
LB: loop body
LE: loop exit
PB: predicated region body
PF: predicated region fallthrough
CT: control target
= control target key end

     0   :  { %9 = vsyncpa [#allocation3], 0  ;;  %s2229_s0 = inlined_call_operand.vmem [shape: bf16[128,16], index: 0, kind: input, shape index: {}]   ;;  %s2230_s1 = inlined_call_operand.vmem [shape: bf16[16,256], index: 1, kind: input, shape index: {}]   ;;  %s2231_s2 = inlined_call_operand.hbm [shape: bf16[2,128,256], index: 2, kind: input, shape index: {}]   ;;  %s2232_s3 = inlined_call_operand.hbm [shape: bf16[3,128,128], index: 3, kind: input, shape index: {}]   ;;  %s2233_s4 = inlined_call_operand.hbm [shape: f32[128,128], index: 4, kind: output, shape index: {}]  }
   0x1   :  { %10 = vsyncpa [#allocation6], 0 }
   0x2   :  { %11 = vsyncpa [#allocation4], 0  ;;  %s1898_s15 = smov [#allocation2]   ;;  %s1826_s19 = scalar_lea.hbm %s2231_s2, 4096 }
   0x3   :  { %s21_s16 = sshll.u32 %s1898_s15, 4  ;;  %p1827_p0 = scmp.ne.s32.totalorder %s2231_s2, %s1826_s19  ;;  %s22_s16 = int_to_ptr.vmem [resolvable:$true] %s21_s16 }
   0x4   :  { %p1830_p1 = scmp.lt.u32.totalorder %s1826_s19, %s2231_s2 }
   0x6   :  { %p1832_p2 = pnand %p1830_p1, %p1827_p0 }
   0x8   :  { %1835 = shalt.err (!%p1832_p2)
}
   0x9   :  { %s1836_s24 = scalar_lea.vmem %s22_s16, 4096  ;;  %p1841_p4 = scmp.lt.s32.totalorder %s22_s16, %s22_s16 }
   0xa   :  { %p1837_p3 = scmp.ne.s32.totalorder %s22_s16, %s1836_s24  ;;  %p1842_p5 = scmp.lt.s32.totalorder %s1836_s24, %s1836_s24 }
   0xc   :  { %p1843_p6 = por %p1842_p5, %p1841_p4 }
   0xe   :  { %p1844_p7 = pnand %p1843_p6, %p1837_p3 }
  0x10   :  { %1847 = shalt.err (!%p1844_p7)
}
  0x11   :  { %s1899_s25 = smov 128   ;;  %s1900_s26 = smov 8  }
  0x12   :  { %27 = dma.hbm_to_vmem [thread:$0]  %s2231_s2, 4096, %s22_s16, [#allocation3], %s1899_s25, %s1899_s25, %s1900_s26  }
  0x13   :  { %s1901_s29 = smov [#allocation5]   ;;  %s1848_s7 = scalar_lea.hbm %s2232_s3, 3072 }
  0x14   :  { %s33_s30 = sshll.u32 %s1901_s29, 4  ;;  %p1849_p8 = scmp.ne.s32.totalorder %s2232_s3, %s1848_s7  ;;  %s34_s30 = int_to_ptr.vmem [resolvable:$true] %s33_s30 }
  0x15   :  { %p1852_p9 = scmp.lt.u32.totalorder %s1848_s7, %s2232_s3 }
  0x17   :  { %p1854_p10 = pnand %p1852_p9, %p1849_p8 }
  0x19   :  { %1857 = shalt.err (!%p1854_p10)
}
  0x1a   :  { %s1858_s12 = scalar_lea.vmem %s34_s30, 3072  ;;  %p1863_p12 = scmp.lt.s32.totalorder %s34_s30, %s34_s30 }
  0x1b   :  { %p1859_p11 = scmp.ne.s32.totalorder %s34_s30, %s1858_s12  ;;  %p1864_p13 = scmp.lt.s32.totalorder %s1858_s12, %s1858_s12 }
  0x1d   :  { %p1865_p0 = por %p1864_p13, %p1863_p12 }
  0x1f   :  { %p1866_p1 = pnand %p1865_p0, %p1859_p11 }
  0x21   :  { %1869 = shalt.err (!%p1866_p1)
}
  0x22   :  { %s1902_s2 = smov 64   ;;  %s1903_s13 = smov 4  }
  0x23   :  { %39 = dma.hbm_to_vmem [thread:$0]  %s2232_s3, 3072, %s34_s30, [#allocation6], %s1902_s2, %s1902_s2, %s1903_s13  }
  0x24   :  { %1892 = dma.done.wait [#allocation3], 4096  }
  0x25   :  { %1893 = vsyncadd [#allocation3], 4294963200 }
  0x26   :  { %1894 = dma.done.wait [#allocation6], 3072  }
  0x27   :  { %1895 = vsyncadd [#allocation6], 4294964224  ;;  %v1904_v0 = vmov 0   ;;  %v1743_v1 = vld [vmem:[%s2230_s1 + $0x4] ss:$8 sps:$4 sm:$0xff]   ;;  %vm115_vm0 = vcmask 130048  }
  0x28   :  { %172 = vmatprep.mubr.bf16.mxu0 %v1904_v0  ;;  %1741 = vset.pattern.permute.xlu0 %v1904_v0  ;;  %v1745_v2 = vld [vmem:[%s2230_s1] ss:$8 sps:$4 sm:$0xff]   ;;  %v1754_v5 = vld [vmem:[#allocation5] sm:$0xff]   ;;  %v1755_v6 = vld [vmem:[#allocation5 + $0x8] sm:$0xff]  }
  0x29   :  { %1742 = vset.pattern.permute.xlu1 %v1904_v0  ;;  %140 = vmatprep.subr.bf16.mxu0 %v1743_v1  ;;  %v1746_v3 = vld [vmem:[%s2229_s0] sm:$0xff]   ;;  %v1747_v4 = vld [vmem:[%s2229_s0 + $0x8] sm:$0xff]   ;;  %v1748_v8 = vld [vmem:[%s2229_s0 + $0x10] sm:$0xff]  }
  0x2a   :  { %141 = vmatpush1.bf16.msra.mxu0 %v1745_v2  ;;  %1612 = vmatprep.subr.bf16.mxu1 %v1754_v5  ;;  %v1756_v7 = vld [vmem:[#allocation5 + $0x10] sm:$0xff]   ;;  %v1757_v9 = vld [vmem:[#allocation5 + $0x18] sm:$0xff]   ;;  %v1758_v10 = vld [vmem:[#allocation5 + $0x20] sm:$0xff]  }
  0x2b   :  { %1613 = vmatpush3.bf16.msra.mxu1 %v1754_v5  ;;  %v1749_v11 = vld [vmem:[%s2229_s0 + $0x18] sm:$0xff]   ;;  %v1760_v13 = vld [vmem:[#allocation5 + $0x30] sm:$0xff]   ;;  %v1751_v15 = vld [vmem:[%s2229_s0 + $0x28] sm:$0xff]  }
  0x2c   :  { %1614 = vmatprep.subr.bf16.mxu1 %v1755_v6  ;;  %v1759_v12 = vld [vmem:[#allocation5 + $0x28] sm:$0xff]   ;;  %v1750_v14 = vld [vmem:[%s2229_s0 + $0x20] sm:$0xff]   ;;  %v1752_v16 = vld [vmem:[%s2229_s0 + $0x30] sm:$0xff]  }
  0x2d   :  { %1476 = vmatmul.mubr.msk.bf16.vlgmr.msra.gmra.mrb[0].mxu0 %vm115_vm0, %v1746_v3  ;;  %v1753_v17 = vld [vmem:[%s2229_s0 + $0x38] sm:$0xff]   ;;  %v1761_v18 = vld [vmem:[#allocation5 + $0x38] sm:$0xff]   ;;  %s1906_s0 = smov [#allocation7]  }
  0x2e   :  { %182 = vmatprep.mubr.bf16.mxu0 %v1904_v0  ;;  %v1764_v19 = vld [vmem:[#allocation2 + $0x4] ss:$8 sps:$4 sm:$0xff]   ;;  %v1762_v25 = vld [vmem:[#allocation2] ss:$8 sps:$4 sm:$0xff]   ;;  %v1767_v27 = vld [vmem:[#allocation2 + $0x14] ss:$8 sps:$4 sm:$0xff]  }
  0x2f   :  { %1615 = vmatpush3.bf16.msra.mxu1 %v1755_v6  ;;  %v1765_v28 = vld [vmem:[#allocation2 + $0x10] ss:$8 sps:$4 sm:$0xff]   ;;  %v1770_v30 = vld [vmem:[#allocation2 + $0x24] ss:$8 sps:$4 sm:$0xff]   ;;  %v1768_v35 = vld [vmem:[#allocation2 + $0x20] ss:$8 sps:$4 sm:$0xff]  }
  0x30   :  { %1616 = vmatprep.subr.bf16.mxu1 %v1756_v7  ;;  %v1773_v37 = vld [vmem:[#allocation2 + $0x34] ss:$8 sps:$4 sm:$0xff]   ;;  %v1771_v38 = vld [vmem:[#allocation2 + $0x30] ss:$8 sps:$4 sm:$0xff]   ;;  %v1776_v40 = vld [vmem:[#allocation2 + $0x44] ss:$8 sps:$4 sm:$0xff]  }
  0x31   :  { %v1774_v45 = vld [vmem:[#allocation2 + $0x40] ss:$8 sps:$4 sm:$0xff]   ;;  %v1779_v47 = vld [vmem:[#allocation2 + $0x54] ss:$8 sps:$4 sm:$0xff]   ;;  %v1777_v48 = vld [vmem:[#allocation2 + $0x50] ss:$8 sps:$4 sm:$0xff]  }
  0x32   :  { %v1782_v50 = vld [vmem:[#allocation2 + $0x64] ss:$8 sps:$4 sm:$0xff]   ;;  %v1780_v55 = vld [vmem:[#allocation2 + $0x60] ss:$8 sps:$4 sm:$0xff]   ;;  %v1785_v57 = vld [vmem:[#allocation2 + $0x74] ss:$8 sps:$4 sm:$0xff]  }
  0x33   :  { %1617 = vmatpush3.bf16.msra.mxu1 %v1756_v7  ;;  %v1783_v58 = vld [vmem:[#allocation2 + $0x70] ss:$8 sps:$4 sm:$0xff]   ;;  %s1453_s10 = sshll.u32 %s1906_s0, 4  ;;  %s1454_s10 = int_to_ptr.vmem [resolvable:$true] %s1453_s10 }
  0x34   :  { %1618 = vmatprep.subr.bf16.mxu1 %v1757_v9  ;;  %s1870_s11 = scalar_lea.vmem %s1454_s10, 2048  ;;  %p1875_p3 = scmp.lt.s32.totalorder %s1454_s10, %s1454_s10 }
  0x35   :  { %1477 = vmatmul.mubr.msk.bf16.gmra.mrb[4].mxu0 %vm115_vm0, %v1747_v4  ;;  %p1871_p2 = scmp.ne.s32.totalorder %s1454_s10, %s1870_s11  ;;  %p1876_p4 = scmp.lt.s32.totalorder %s1870_s11, %s1870_s11 }
  0x36   :  { %192 = vmatprep.mubr.bf16.mxu0 %v1904_v0 }
  0x37   :  { %1619 = vmatpush3.bf16.msra.mxu1 %v1757_v9  ;;  %p1877_p5 = por %p1876_p4, %p1875_p3 }
  0x38   :  { %1620 = vmatprep.subr.bf16.mxu1 %v1758_v10 }
  0x39   :  { %p1878_p6 = pnand %p1877_p5, %p1871_p2 }
  0x3b   :  { %1621 = vmatpush3.bf16.msra.mxu1 %v1758_v10 }
  0x3c   :  { %1622 = vmatprep.subr.bf16.mxu1 %v1759_v12 }
  0x3d   :  { %1478 = vmatmul.mubr.msk.bf16.gmra.mrb[8].mxu0 %vm115_vm0, %v1748_v8 }
  0x3e   :  { %202 = vmatprep.mubr.bf16.mxu0 %v1904_v0 }
  0x3f   :  { %1623 = vmatpush3.bf16.msra.mxu1 %v1759_v12 }
  0x40   :  { %1624 = vmatprep.subr.bf16.mxu1 %v1760_v13 }
  0x43   :  { %1625 = vmatpush3.bf16.msra.mxu1 %v1760_v13 }
  0x44   :  { %1626 = vmatprep.subr.bf16.mxu1 %v1761_v18 }
  0x45   :  { %1479 = vmatmul.mubr.msk.bf16.gmra.mrb[12].mxu0 %vm115_vm0, %v1749_v11 }
  0x46   :  { %212 = vmatprep.mubr.bf16.mxu0 %v1904_v0 }
  0x47   :  { %1627 = vmatpush3.bf16.msra.mxu1 %v1761_v18 }
  0x48   :  { %558 = vmatprep.subr.bf16.mxu1 %v1764_v19  ;;  %v1905_v19 = vmov 0.0  }
  0x4d   :  { %1480 = vmatmul.mubr.msk.bf16.gmra.mrb[16].mxu0 %vm115_vm0, %v1750_v14 }
  0x4e   :  { %222 = vmatprep.mubr.bf16.mxu0 %v1904_v0 }
  0x55   :  { %1481 = vmatmul.mubr.msk.bf16.gmra.mrb[20].mxu0 %vm115_vm0, %v1751_v15 }
  0x56   :  { %232 = vmatprep.mubr.bf16.mxu0 %v1904_v0 }
  0x5d   :  { %1482 = vmatmul.mubr.msk.bf16.gmra.mrb[24].mxu0 %vm115_vm0, %v1752_v16 }
  0x5e   :  { %242 = vmatprep.mubr.bf16.mxu0 %v1904_v0 }
  0x65   :  { %1483 = vmatmul.mubr.msk.bf16.gmra.mrb[28].mxu0 %vm115_vm0, %v1753_v17 }
 0x100   :  { %v1997_v20 = vpop.f32.mrb[0].mxu0 }
 0x101   :  { %v176_v21 = vpop.f32.mrb[1].mxu0 }
 0x102   :  { %v1999_v22 = vpop.f32.mrb[2].mxu0  ;;  %v253_v23 = vand.u32 2147483647, %v176_v21  ;;  %v1786_v21 = vld [vmem:[#allocation5 + $0x40] sm:$0xff]  }
 0x103   :  { %v180_v24 = vpop.f32.mrb[3].mxu0  ;;  %1652 = vmatprep.subr.bf16.mxu0 %v1786_v21 }
 0x104   :  { %v254_v26 = vand.u32 2147483647, %v180_v24  ;;  %1628 = vmatprep.mubr.f32.mxu1 %v253_v23  ;;  %v1787_v23 = vld [vmem:[#allocation5 + $0x48] sm:$0xff]   ;;  %1653 = vmatpush3.bf16.msra.mxu0 %v1786_v21  ;;  %v1788_v24 = vld [vmem:[#allocation5 + $0x50] sm:$0xff]  }
 0x105   :  { %1654 = vmatprep.subr.bf16.mxu0 %v1787_v23  ;;  %v1808_v21 = vld [vmem:[#allocation2 + $0xc4] ss:$8 sps:$4 sm:$0xff]  }
 0x106   :  { %1629 = vmatmul.mubr.f32.vlgmr.msra.gmra.mrb[0].mxu1 %v254_v26  ;;  %v1790_v26 = vld [vmem:[#allocation5 + $0x60] sm:$0xff]  }
 0x107   :  { %559 = vmatpush1.bf16.msra.mxu1 %v1762_v25  ;;  %v1789_v25 = vld [vmem:[#allocation5 + $0x58] sm:$0xff]  }
 0x108   :  { %v2001_v29 = vpop.f32.mrb[4].mxu0  ;;  %560 = vmatprep.subr.bf16.mxu1 %v1767_v27  ;;  %1655 = vmatpush3.bf16.msra.mxu0 %v1787_v23  ;;  %v1791_v27 = vld [vmem:[#allocation5 + $0x68] sm:$0xff]  }
 0x109   :  { %v186_v31 = vpop.f32.mrb[5].mxu0  ;;  %1656 = vmatprep.subr.bf16.mxu0 %v1788_v24 }
 0x10a   :  { %v255_v32 = vand.u32 2147483647, %v186_v31  ;;  %v2003_v33 = vpop.f32.mrb[6].mxu0 }
 0x10b   :  { %v190_v34 = vpop.f32.mrb[7].mxu0  ;;  %561 = vmatpush1.bf16.msra.mxu1 %v1765_v28  ;;  %v1792_v28 = vld [vmem:[#allocation5 + $0x70] sm:$0xff]  }
 0x10c   :  { %v256_v36 = vand.u32 2147483647, %v190_v34  ;;  %1631 = vmatprep.mubr.f32.mxu1 %v255_v32  ;;  %562 = vmatprep.subr.bf16.mxu1 %v1770_v30  ;;  %v1793_v30 = vld [vmem:[#allocation5 + $0x78] sm:$0xff]  }
 0x10d   :  { %1657 = vmatpush3.bf16.msra.mxu0 %v1788_v24 }
 0x10e   :  { %1632 = vmatmul.mubr.f32.gmra.mrb[2].mxu1 %v256_v36  ;;  %1658 = vmatprep.subr.bf16.mxu0 %v1789_v25 }
 0x10f   :  { %563 = vmatpush1.bf16.msra.mxu1 %v1768_v35 }
 0x110   :  { %v2005_v39 = vpop.f32.mrb[8].mxu0  ;;  %564 = vmatprep.subr.bf16.mxu1 %v1773_v37 }
 0x111   :  { %v196_v41 = vpop.f32.mrb[9].mxu0  ;;  %1659 = vmatpush3.bf16.msra.mxu0 %v1789_v25  ;;  %v1806_v25 = vld [vmem:[#allocation2 + $0xc0] ss:$8 sps:$4 sm:$0xff]  }
 0x112   :  { %v257_v42 = vand.u32 2147483647, %v196_v41  ;;  %v2007_v43 = vpop.f32.mrb[10].mxu0  ;;  %1660 = vmatprep.subr.bf16.mxu0 %v1790_v26 }
 0x113   :  { %v200_v44 = vpop.f32.mrb[11].mxu0  ;;  %565 = vmatpush1.bf16.msra.mxu1 %v1771_v38 }
 0x114   :  { %v258_v46 = vand.u32 2147483647, %v200_v44  ;;  %1634 = vmatprep.mubr.f32.mxu1 %v257_v42  ;;  %566 = vmatprep.subr.bf16.mxu1 %v1776_v40 }
 0x115   :  { %1661 = vmatpush3.bf16.msra.mxu0 %v1790_v26 }
 0x116   :  { %1635 = vmatmul.mubr.f32.gmra.mrb[4].mxu1 %v258_v46  ;;  %1662 = vmatprep.subr.bf16.mxu0 %v1791_v27 }
 0x117   :  { %567 = vmatpush1.bf16.msra.mxu1 %v1774_v45 }
 0x118   :  { %v2009_v49 = vpop.f32.mrb[12].mxu0  ;;  %568 = vmatprep.subr.bf16.mxu1 %v1779_v47 }
 0x119   :  { %v206_v51 = vpop.f32.mrb[13].mxu0  ;;  %1663 = vmatpush3.bf16.msra.mxu0 %v1791_v27  ;;  %v1811_v27 = vld [vmem:[#allocation2 + $0xd4] ss:$8 sps:$4 sm:$0xff]  }
 0x11a   :  { %v259_v52 = vand.u32 2147483647, %v206_v51  ;;  %v2011_v53 = vpop.f32.mrb[14].mxu0  ;;  %1664 = vmatprep.subr.bf16.mxu0 %v1792_v28 }
 0x11b   :  { %v210_v54 = vpop.f32.mrb[15].mxu0  ;;  %569 = vmatpush1.bf16.msra.mxu1 %v1777_v48 }
 0x11c   :  { %v260_v56 = vand.u32 2147483647, %v210_v54  ;;  %1637 = vmatprep.mubr.f32.mxu1 %v259_v52  ;;  %570 = vmatprep.subr.bf16.mxu1 %v1782_v50 }
 0x11d   :  { %1665 = vmatpush3.bf16.msra.mxu0 %v1792_v28 }
 0x11e   :  { %1638 = vmatmul.mubr.f32.gmra.mrb[6].mxu1 %v260_v56  ;;  %1666 = vmatprep.subr.bf16.mxu0 %v1793_v30 }
 0x11f   :  { %571 = vmatpush1.bf16.msra.mxu1 %v1780_v55 }
 0x120   :  { %v2013_v59 = vpop.f32.mrb[16].mxu0  ;;  %572 = vmatprep.subr.bf16.mxu1 %v1785_v57 }
 0x121   :  { %v216_v60 = vpop.f32.mrb[17].mxu0  ;;  %1667 = vmatpush3.bf16.msra.mxu0 %v1793_v30 }
 0x122   :  { %v261_v61 = vand.u32 2147483647, %v216_v60  ;;  %v2015_v62 = vpop.f32.mrb[18].mxu0  ;;  %v1796_v60 = vld [vmem:[#allocation2 + $0x84] ss:$8 sps:$4 sm:$0xff]  }
 0x123   :  { %v220_v63 = vpop.f32.mrb[19].mxu0  ;;  %573 = vmatpush1.bf16.msra.mxu1 %v1783_v58  ;;  %994 = vmatprep.subr.bf16.mxu0 %v1796_v60 }
 0x124   :  { %v262_v0 = vand.u32 2147483647, %v220_v63  ;;  %1640 = vmatprep.mubr.f32.mxu1 %v261_v61 }
 0x126   :  { %1641 = vmatmul.mubr.f32.gmra.mrb[8].mxu1 %v262_v0 }
 0x128   :  { %v2017_v1 = vpop.f32.mrb[20].mxu0 }
 0x129   :  { %v226_v2 = vpop.f32.mrb[21].mxu0 }
 0x12a   :  { %v263_v3 = vand.u32 2147483647, %v226_v2  ;;  %v2019_v4 = vpop.f32.mrb[22].mxu0  ;;  %v1794_v2 = vld [vmem:[#allocation2 + $0x80] ss:$8 sps:$4 sm:$0xff]  }
 0x12b   :  { %v230_v5 = vpop.f32.mrb[23].mxu0 }
 0x12c   :  { %v264_v6 = vand.u32 2147483647, %v230_v5  ;;  %1643 = vmatprep.mubr.f32.mxu1 %v263_v3 }
 0x12e   :  { %1644 = vmatmul.mubr.f32.gmra.mrb[10].mxu1 %v264_v6 }
 0x130   :  { %v2021_v7 = vpop.f32.mrb[24].mxu0 }
 0x131   :  { %v236_v8 = vpop.f32.mrb[25].mxu0 }
 0x132   :  { %v265_v9 = vand.u32 2147483647, %v236_v8  ;;  %v2023_v10 = vpop.f32.mrb[26].mxu0 }
 0x133   :  { %v240_v11 = vpop.f32.mrb[27].mxu0 }
 0x134   :  { %v266_v12 = vand.u32 2147483647, %v240_v11  ;;  %1646 = vmatprep.mubr.f32.mxu1 %v265_v9  ;;  %v1802_v9 = vld [vmem:[#allocation2 + $0xa4] ss:$8 sps:$4 sm:$0xff]  }
 0x136   :  { %1647 = vmatmul.mubr.f32.gmra.mrb[12].mxu1 %v266_v12  ;;  %v1800_v12 = vld [vmem:[#allocation2 + $0xa0] ss:$8 sps:$4 sm:$0xff]  }
 0x138   :  { %v2025_v13 = vpop.f32.mrb[28].mxu0 }
 0x139   :  { %v246_v14 = vpop.f32.mrb[29].mxu0 }
 0x13a   :  { %v267_v15 = vand.u32 2147483647, %v246_v14  ;;  %v2027_v16 = vpop.f32.mrb[30].mxu0  ;;  %v1805_v14 = vld [vmem:[#allocation2 + $0xb4] ss:$8 sps:$4 sm:$0xff]  }
 0x13b   :  { %v250_v17 = vpop.f32.mrb[31].mxu0 }
 0x13c   :  { %v268_v18 = vand.u32 2147483647, %v250_v17  ;;  %1649 = vmatprep.mubr.f32.mxu1 %v267_v15  ;;  %v1803_v17 = vld [vmem:[#allocation2 + $0xb0] ss:$8 sps:$4 sm:$0xff]  }
 0x13e   :  { %1650 = vmatmul.mubr.f32.gmra.mrb[14].mxu1 %v268_v18 }
 0x13f   :  { %590 = vmatprep.mubr.f32.mxu1 %v1905_v19 }
 0x1d9   :  { %v1630_v31 = vpop.f32.mrb[0].mxu1 }
 0x1da   :  { %v2031_v32 = vadd.f32 %v1630_v31, %v1999_v22  ;;  %v367_v34 = vpop.f32.mrb[1].mxu1  ;;  %v1809_v31 = vld [vmem:[#allocation2 + $0xd0] ss:$8 sps:$4 sm:$0xff]  }
 0x1db   :  { %v2034_v35 = vadd.f32 %v367_v34, %v1997_v20 }
 0x1dd   :  { %591 = vmatmul.mubr.f32.vlgmr.msra.gmra.mrb[16].mxu1 %v2034_v35 }
 0x1de   :  { %596 = vmatprep.mubr.f32.mxu1 %v1905_v19 }
 0x1e1   :  { %v1633_v36 = vpop.f32.mrb[2].mxu1  ;;  %597 = vmatmul.mubr.f32.gmra.mrb[18].mxu1 %v2031_v32 }
 0x1e2   :  { %v2040_v37 = vadd.f32 %v1633_v36, %v2003_v33  ;;  %v377_v38 = vpop.f32.mrb[3].mxu1  ;;  %602 = vmatprep.mubr.f32.mxu1 %v1905_v19  ;;  %v1814_v36 = vld [vmem:[#allocation2 + $0xe4] ss:$8 sps:$4 sm:$0xff]  }
 0x1e3   :  { %v2044_v22 = vadd.f32 %v377_v38, %v2001_v29 }
 0x1e5   :  { %603 = vmatmul.mubr.f32.gmra.mrb[20].mxu1 %v2044_v22 }
 0x1e6   :  { %608 = vmatprep.mubr.f32.mxu1 %v1905_v19 }
 0x1e9   :  { %v1636_v20 = vpop.f32.mrb[4].mxu1  ;;  %609 = vmatmul.mubr.f32.gmra.mrb[22].mxu1 %v2040_v37 }
 0x1ea   :  { %v2050_v40 = vadd.f32 %v1636_v20, %v2007_v43  ;;  %v387_v41 = vpop.f32.mrb[5].mxu1  ;;  %614 = vmatprep.mubr.f32.mxu1 %v1905_v19 }
 0x1eb   :  { %v2054_v33 = vadd.f32 %v387_v41, %v2005_v39  ;;  %v1812_v41 = vld [vmem:[#allocation2 + $0xe0] ss:$8 sps:$4 sm:$0xff]  }
 0x1ed   :  { %615 = vmatmul.mubr.f32.gmra.mrb[24].mxu1 %v2054_v33 }
 0x1ee   :  { %620 = vmatprep.mubr.f32.mxu1 %v1905_v19 }
 0x1f1   :  { %v1639_v29 = vpop.f32.mrb[6].mxu1  ;;  %621 = vmatmul.mubr.f32.gmra.mrb[26].mxu1 %v2050_v40 }
 0x1f2   :  { %v2060_v42 = vadd.f32 %v1639_v29, %v2011_v53  ;;  %v397_v44 = vpop.f32.mrb[7].mxu1  ;;  %626 = vmatprep.mubr.f32.mxu1 %v1905_v19 }
 0x1f3   :  { %v2064_v43 = vadd.f32 %v397_v44, %v2009_v49  ;;  %v1817_v44 = vld [vmem:[#allocation2 + $0xf4] ss:$8 sps:$4 sm:$0xff]  }
 0x1f5   :  { %627 = vmatmul.mubr.f32.gmra.mrb[28].mxu1 %v2064_v43 }
 0x1f6   :  { %632 = vmatprep.mubr.f32.mxu1 %v1905_v19 }
 0x1f9   :  { %v1642_v39 = vpop.f32.mrb[8].mxu1  ;;  %633 = vmatmul.mubr.f32.gmra.mrb[30].mxu1 %v2060_v42 }
 0x1fa   :  { %v2070_v45 = vadd.f32 %v1642_v39, %v2015_v62  ;;  %v407_v46 = vpop.f32.mrb[9].mxu1  ;;  %638 = vmatprep.mubr.f32.mxu1 %v1905_v19 }
 0x1fb   :  { %v2074_v47 = vadd.f32 %v407_v46, %v2013_v59 }
 0x1fd   :  { %639 = vmatmul.mubr.f32.gmra.mrb[32].mxu1 %v2074_v47 }
 0x1fe   :  { %644 = vmatprep.mubr.f32.mxu1 %v1905_v19 }
 0x201   :  { %v1645_v48 = vpop.f32.mrb[10].mxu1  ;;  %645 = vmatmul.mubr.f32.gmra.mrb[34].mxu1 %v2070_v45 }
 0x202   :  { %v2080_v49 = vadd.f32 %v1645_v48, %v2019_v4  ;;  %v417_v50 = vpop.f32.mrb[11].mxu1  ;;  %650 = vmatprep.mubr.f32.mxu1 %v1905_v19  ;;  %v1799_v4 = vld [vmem:[#allocation2 + $0x94] ss:$8 sps:$4 sm:$0xff]   ;;  %v1815_v48 = vld [vmem:[#allocation2 + $0xf0] ss:$8 sps:$4 sm:$0xff]  }
 0x203   :  { %v2084_v51 = vadd.f32 %v417_v50, %v2017_v1 }
 0x205   :  { %651 = vmatmul.mubr.f32.gmra.mrb[36].mxu1 %v2084_v51 }
 0x206   :  { %656 = vmatprep.mubr.f32.mxu1 %v1905_v19 }
 0x209   :  { %v1648_v52 = vpop.f32.mrb[12].mxu1  ;;  %657 = vmatmul.mubr.f32.gmra.mrb[38].mxu1 %v2080_v49 }
 0x20a   :  { %v2090_v53 = vadd.f32 %v1648_v52, %v2023_v10  ;;  %v427_v54 = vpop.f32.mrb[13].mxu1  ;;  %662 = vmatprep.mubr.f32.mxu1 %v1905_v19 }
 0x20b   :  { %v2094_v55 = vadd.f32 %v427_v54, %v2021_v7  ;;  %v1797_v7 = vld [vmem:[#allocation2 + $0x90] ss:$8 sps:$4 sm:$0xff]  }
 0x20d   :  { %663 = vmatmul.mubr.f32.gmra.mrb[40].mxu1 %v2094_v55 }
 0x20e   :  { %668 = vmatprep.mubr.f32.mxu1 %v1905_v19 }
 0x211   :  { %v1651_v56 = vpop.f32.mrb[14].mxu1  ;;  %669 = vmatmul.mubr.f32.gmra.mrb[42].mxu1 %v2090_v53 }
 0x212   :  { %v2100_v57 = vadd.f32 %v1651_v56, %v2027_v16  ;;  %v437_v58 = vpop.f32.mrb[15].mxu1  ;;  %674 = vmatprep.mubr.f32.mxu1 %v1905_v19 }
 0x213   :  { %v2104_v59 = vadd.f32 %v437_v58, %v2025_v13 }
 0x215   :  { %675 = vmatmul.mubr.f32.gmra.mrb[44].mxu1 %v2104_v59 }
 0x216   :  { %680 = vmatprep.mubr.f32.mxu1 %v1905_v19 }
 0x219   :  { %681 = vmatmul.mubr.f32.gmra.mrb[46].mxu1 %v2100_v57 }
 0x2b0   :  { %v2109_v61 = vpop.f32.mrb[16].mxu1 }
 0x2b1   :  { %v594_v62 = vpop.f32.mrb[17].mxu1 }
 0x2b2   :  { %v687_v63 = vand.u32 2147483647, %v594_v62 }
 0x2b4   :  { %v2111_v0 = vpop.f32.mrb[18].mxu1  ;;  %1668 = vmatprep.mubr.f32.mxu0 %v687_v63 }
 0x2b5   :  { %v600_v1 = vpop.f32.mrb[19].mxu1 }
 0x2b6   :  { %v688_v3 = vand.u32 2147483647, %v600_v1 }
 0x2b8   :  { %v2113_v5 = vpop.f32.mrb[20].mxu1  ;;  %1669 = vmatmul.mubr.f32.vlgmr.msra.gmra.mrb[32].mxu0 %v688_v3 }
 0x2b9   :  { %v606_v6 = vpop.f32.mrb[21].mxu1  ;;  %995 = vmatpush1.bf16.msra.mxu0 %v1794_v2 }
 0x2ba   :  { %v689_v8 = vand.u32 2147483647, %v606_v6  ;;  %996 = vmatprep.subr.bf16.mxu0 %v1799_v4 }
 0x2bc   :  { %v2115_v10 = vpop.f32.mrb[22].mxu1  ;;  %1671 = vmatprep.mubr.f32.mxu0 %v689_v8 }
 0x2bd   :  { %v612_v11 = vpop.f32.mrb[23].mxu1  ;;  %997 = vmatpush1.bf16.msra.mxu0 %v1797_v7 }
 0x2be   :  { %v690_v13 = vand.u32 2147483647, %v612_v11  ;;  %998 = vmatprep.subr.bf16.mxu0 %v1802_v9 }
 0x2c0   :  { %v2117_v15 = vpop.f32.mrb[24].mxu1  ;;  %1672 = vmatmul.mubr.f32.gmra.mrb[34].mxu0 %v690_v13 }
 0x2c1   :  { %v618_v16 = vpop.f32.mrb[25].mxu1  ;;  %999 = vmatpush1.bf16.msra.mxu0 %v1800_v12 }
 0x2c2   :  { %v691_v18 = vand.u32 2147483647, %v618_v16  ;;  %1000 = vmatprep.subr.bf16.mxu0 %v1805_v14 }
 0x2c4   :  { %v2119_v23 = vpop.f32.mrb[26].mxu1  ;;  %1674 = vmatprep.mubr.f32.mxu0 %v691_v18  ;;  %v1818_v18 = vld [vmem:[#allocation5 + $0x80] sm:$0xff]  }
 0x2c5   :  { %v624_v24 = vpop.f32.mrb[27].mxu1  ;;  %1001 = vmatpush1.bf16.msra.mxu0 %v1803_v17  ;;  %1692 = vmatprep.subr.bf16.mxu1 %v1818_v18 }
 0x2c6   :  { %v692_v26 = vand.u32 2147483647, %v624_v24  ;;  %1002 = vmatprep.subr.bf16.mxu0 %v1808_v21  ;;  %v1819_v21 = vld [vmem:[#allocation5 + $0x88] sm:$0xff]   ;;  %1693 = vmatpush3.bf16.msra.mxu1 %v1818_v18  ;;  %v1820_v24 = vld [vmem:[#allocation5 + $0x90] sm:$0xff]  }
 0x2c7   :  { %1694 = vmatprep.subr.bf16.mxu1 %v1819_v21 }
 0x2c8   :  { %v2121_v28 = vpop.f32.mrb[28].mxu1  ;;  %1675 = vmatmul.mubr.f32.gmra.mrb[36].mxu0 %v692_v26  ;;  %v1822_v26 = vld [vmem:[#allocation5 + $0xa0] sm:$0xff]  }
 0x2c9   :  { %v630_v30 = vpop.f32.mrb[29].mxu1  ;;  %1003 = vmatpush1.bf16.msra.mxu0 %v1806_v25  ;;  %v1821_v25 = vld [vmem:[#allocation5 + $0x98] sm:$0xff]  }
 0x2ca   :  { %v693_v34 = vand.u32 2147483647, %v630_v30  ;;  %1004 = vmatprep.subr.bf16.mxu0 %v1811_v27  ;;  %1695 = vmatpush3.bf16.msra.mxu1 %v1819_v21  ;;  %v1823_v27 = vld [vmem:[#allocation5 + $0xa8] sm:$0xff]  }
 0x2cb   :  { %1696 = vmatprep.subr.bf16.mxu1 %v1820_v24 }
 0x2cc   :  { %v2123_v38 = vpop.f32.mrb[30].mxu1  ;;  %1677 = vmatprep.mubr.f32.mxu0 %v693_v34 }
 0x2cd   :  { %v636_v20 = vpop.f32.mrb[31].mxu1  ;;  %1005 = vmatpush1.bf16.msra.mxu0 %v1809_v31 }
 0x2ce   :  { %v694_v29 = vand.u32 2147483647, %v636_v20  ;;  %1006 = vmatprep.subr.bf16.mxu0 %v1814_v36  ;;  %1697 = vmatpush3.bf16.msra.mxu1 %v1820_v24 }
 0x2cf   :  { %1698 = vmatprep.subr.bf16.mxu1 %v1821_v25 }
 0x2d0   :  { %v2125_v39 = vpop.f32.mrb[32].mxu1  ;;  %1678 = vmatmul.mubr.f32.gmra.mrb[38].mxu0 %v694_v29 }
 0x2d1   :  { %v642_v46 = vpop.f32.mrb[33].mxu1  ;;  %1007 = vmatpush1.bf16.msra.mxu0 %v1812_v41 }
 0x2d2   :  { %v695_v50 = vand.u32 2147483647, %v642_v46  ;;  %1008 = vmatprep.subr.bf16.mxu0 %v1817_v44  ;;  %1699 = vmatpush3.bf16.msra.mxu1 %v1821_v25 }
 0x2d3   :  { %1700 = vmatprep.subr.bf16.mxu1 %v1822_v26 }
 0x2d4   :  { %v2127_v52 = vpop.f32.mrb[34].mxu1  ;;  %1680 = vmatprep.mubr.f32.mxu0 %v695_v50 }
 0x2d5   :  { %v648_v54 = vpop.f32.mrb[35].mxu1  ;;  %1009 = vmatpush1.bf16.msra.mxu0 %v1815_v48 }
 0x2d6   :  { %v696_v56 = vand.u32 2147483647, %v648_v54  ;;  %1701 = vmatpush3.bf16.msra.mxu1 %v1822_v26 }
 0x2d7   :  { %1702 = vmatprep.subr.bf16.mxu1 %v1823_v27 }
 0x2d8   :  { %v2129_v58 = vpop.f32.mrb[36].mxu1  ;;  %1681 = vmatmul.mubr.f32.gmra.mrb[40].mxu0 %v696_v56 }
 0x2d9   :  { %v654_v60 = vpop.f32.mrb[37].mxu1 }
 0x2da   :  { %v697_v62 = vand.u32 2147483647, %v654_v60  ;;  %1703 = vmatpush3.bf16.msra.mxu1 %v1823_v27 }
 0x2dc   :  { %v2131_v63 = vpop.f32.mrb[38].mxu1  ;;  %1683 = vmatprep.mubr.f32.mxu0 %v697_v62 }
 0x2dd   :  { %v660_v1 = vpop.f32.mrb[39].mxu1 }
 0x2de   :  { %v698_v2 = vand.u32 2147483647, %v660_v1 }
 0x2e0   :  { %v2133_v3 = vpop.f32.mrb[40].mxu1  ;;  %1684 = vmatmul.mubr.f32.gmra.mrb[42].mxu0 %v698_v2 }
 0x2e1   :  { %v666_v4 = vpop.f32.mrb[41].mxu1 }
 0x2e2   :  { %v699_v6 = vand.u32 2147483647, %v666_v4 }
 0x2e4   :  { %v2135_v7 = vpop.f32.mrb[42].mxu1  ;;  %1686 = vmatprep.mubr.f32.mxu0 %v699_v6 }
 0x2e5   :  { %v672_v8 = vpop.f32.mrb[43].mxu1 }
 0x2e6   :  { %v700_v9 = vand.u32 2147483647, %v672_v8 }
 0x2e8   :  { %v2137_v11 = vpop.f32.mrb[44].mxu1  ;;  %1687 = vmatmul.mubr.f32.gmra.mrb[44].mxu0 %v700_v9 }
 0x2e9   :  { %v678_v12 = vpop.f32.mrb[45].mxu1 }
 0x2ea   :  { %v701_v13 = vand.u32 2147483647, %v678_v12 }
 0x2ec   :  { %v2139_v14 = vpop.f32.mrb[46].mxu1  ;;  %1689 = vmatprep.mubr.f32.mxu0 %v701_v13 }
 0x2ed   :  { %v684_v16 = vpop.f32.mrb[47].mxu1 }
 0x2ee   :  { %v702_v17 = vand.u32 2147483647, %v684_v16 }
 0x2f0   :  { %1690 = vmatmul.mubr.f32.gmra.mrb[46].mxu0 %v702_v17 }
 0x2f1   :  { %1026 = vmatprep.mubr.f32.mxu0 %v1905_v19 }
 0x38b   :  { %v1670_v30 = vpop.f32.mrb[32].mxu0 }
 0x38c   :  { %v882_v31 = vadd.f32 %v1670_v30, %v2111_v0  ;;  %v802_v34 = vpop.f32.mrb[33].mxu0 }
 0x38d   :  { %v881_v36 = vadd.f32 %v802_v34, %v2109_v61 }
 0x38f   :  { %1027 = vmatmul.mubr.f32.vlgmr.msra.gmra.mrb[48].mxu0 %v881_v36 }
 0x390   :  { %1032 = vmatprep.mubr.f32.mxu0 %v1905_v19 }
 0x393   :  { %v1673_v20 = vpop.f32.mrb[34].mxu0  ;;  %1033 = vmatmul.mubr.f32.gmra.mrb[50].mxu0 %v882_v31 }
 0x394   :  { %v884_v41 = vadd.f32 %v1673_v20, %v2115_v10  ;;  %v812_v29 = vpop.f32.mrb[35].mxu0  ;;  %1038 = vmatprep.mubr.f32.mxu0 %v1905_v19 }
 0x395   :  { %v883_v44 = vadd.f32 %v812_v29, %v2113_v5 }
 0x397   :  { %1039 = vmatmul.mubr.f32.gmra.mrb[52].mxu0 %v883_v44 }
 0x398   :  { %1044 = vmatprep.mubr.f32.mxu0 %v1905_v19 }
 0x39b   :  { %v1676_v46 = vpop.f32.mrb[36].mxu0  ;;  %1045 = vmatmul.mubr.f32.gmra.mrb[54].mxu0 %v884_v41 }
 0x39c   :  { %v886_v0 = vadd.f32 %v1676_v46, %v2119_v23  ;;  %v822_v61 = vpop.f32.mrb[37].mxu0  ;;  %1050 = vmatprep.mubr.f32.mxu0 %v1905_v19 }
 0x39d   :  { %v885_v48 = vadd.f32 %v822_v61, %v2117_v15 }
 0x39f   :  { %1051 = vmatmul.mubr.f32.gmra.mrb[56].mxu0 %v885_v48 }
 0x3a0   :  { %1056 = vmatprep.mubr.f32.mxu0 %v1905_v19 }
 0x3a3   :  { %v1679_v10 = vpop.f32.mrb[38].mxu0  ;;  %1057 = vmatmul.mubr.f32.gmra.mrb[58].mxu0 %v886_v0 }
 0x3a4   :  { %v888_v50 = vadd.f32 %v1679_v10, %v2123_v38  ;;  %v832_v5 = vpop.f32.mrb[39].mxu0  ;;  %1062 = vmatprep.mubr.f32.mxu0 %v1905_v19 }
 0x3a5   :  { %v887_v54 = vadd.f32 %v832_v5, %v2121_v28 }
 0x3a7   :  { %1063 = vmatmul.mubr.f32.gmra.mrb[60].mxu0 %v887_v54 }
 0x3a8   :  { %1068 = vmatprep.mubr.f32.mxu0 %v1905_v19 }
 0x3ab   :  { %v1682_v23 = vpop.f32.mrb[40].mxu0  ;;  %1069 = vmatmul.mubr.f32.gmra.mrb[62].mxu0 %v888_v50 }
 0x3ac   :  { %v890_v56 = vadd.f32 %v1682_v23, %v2127_v52  ;;  %v842_v15 = vpop.f32.mrb[41].mxu0  ;;  %1074 = vmatprep.mubr.f32.mxu0 %v1905_v19 }
 0x3ad   :  { %v889_v60 = vadd.f32 %v842_v15, %v2125_v39 }
 0x3af   :  { %1075 = vmatmul.mubr.f32.gmra.mrb[64].mxu0 %v889_v60 }
 0x3b0   :  { %1080 = vmatprep.mubr.f32.mxu0 %v1905_v19 }
 0x3b3   :  { %v1685_v38 = vpop.f32.mrb[42].mxu0  ;;  %1081 = vmatmul.mubr.f32.gmra.mrb[66].mxu0 %v890_v56 }
 0x3b4   :  { %v892_v62 = vadd.f32 %v1685_v38, %v2131_v63  ;;  %v852_v28 = vpop.f32.mrb[43].mxu0  ;;  %1086 = vmatprep.mubr.f32.mxu0 %v1905_v19 }
 0x3b5   :  { %v891_v1 = vadd.f32 %v852_v28, %v2129_v58 }
 0x3b7   :  { %1087 = vmatmul.mubr.f32.gmra.mrb[68].mxu0 %v891_v1 }
 0x3b8   :  { %1092 = vmatprep.mubr.f32.mxu0 %v1905_v19 }
 0x3bb   :  { %v1688_v52 = vpop.f32.mrb[44].mxu0  ;;  %1093 = vmatmul.mubr.f32.gmra.mrb[70].mxu0 %v892_v62 }
 0x3bc   :  { %v894_v2 = vadd.f32 %v1688_v52, %v2135_v7  ;;  %v862_v39 = vpop.f32.mrb[45].mxu0  ;;  %1098 = vmatprep.mubr.f32.mxu0 %v1905_v19  ;;  %v1824_v7 = vld [vmem:[#allocation5 + $0xb0] sm:$0xff]  }
 0x3bd   :  { %v893_v4 = vadd.f32 %v862_v39, %v2133_v3  ;;  %1704 = vmatprep.subr.bf16.mxu1 %v1824_v7  ;;  %v1825_v3 = vld [vmem:[#allocation5 + $0xb8] sm:$0xff]  }
 0x3be   :  { %1705 = vmatpush3.bf16.msra.mxu1 %v1824_v7 }
 0x3bf   :  { %1099 = vmatmul.mubr.f32.gmra.mrb[72].mxu0 %v893_v4  ;;  %1706 = vmatprep.subr.bf16.mxu1 %v1825_v3 }
 0x3c0   :  { %1104 = vmatprep.mubr.f32.mxu0 %v1905_v19 }
 0x3c2   :  { %1707 = vmatpush3.bf16.msra.mxu1 %v1825_v3 }
 0x3c3   :  { %v1691_v63 = vpop.f32.mrb[46].mxu0  ;;  %1105 = vmatmul.mubr.f32.gmra.mrb[74].mxu0 %v894_v2 }
 0x3c4   :  { %v896_v6 = vadd.f32 %v1691_v63, %v2139_v14  ;;  %v872_v58 = vpop.f32.mrb[47].mxu0  ;;  %1110 = vmatprep.mubr.f32.mxu0 %v1905_v19 }
 0x3c5   :  { %v895_v8 = vadd.f32 %v872_v58, %v2137_v11 }
 0x3c7   :  { %1111 = vmatmul.mubr.f32.gmra.mrb[76].mxu0 %v895_v8 }
 0x3c8   :  { %1116 = vmatprep.mubr.f32.mxu0 %v1905_v19 }
 0x3cb   :  { %1117 = vmatmul.mubr.f32.gmra.mrb[78].mxu0 %v896_v6 }
 0x462   :  { %v2173_v9 = vpop.f32.mrb[48].mxu0 }
 0x463   :  { %v1030_v12 = vpop.f32.mrb[49].mxu0 }
 0x464   :  { %v1123_v13 = vand.u32 2147483647, %v1030_v12 }
 0x466   :  { %v1034_v14 = vpop.f32.mrb[50].mxu0  ;;  %1708 = vmatprep.mubr.f32.mxu1 %v1123_v13 }
 0x467   :  { %v1036_v16 = vpop.f32.mrb[51].mxu0 }
 0x468   :  { %v1124_v17 = vand.u32 2147483647, %v1036_v16 }
 0x46a   :  { %v2175_v18 = vpop.f32.mrb[52].mxu0  ;;  %1709 = vmatmul.mubr.f32.vlgmr.msra.gmra.mrb[48].mxu1 %v1124_v17 }
 0x46b   :  { %v1042_v11 = vpop.f32.mrb[53].mxu0 }
 0x46c   :  { %v1125_v19 = vand.u32 2147483647, %v1042_v11 }
 0x46e   :  { %v1046_v21 = vpop.f32.mrb[54].mxu0  ;;  %1711 = vmatprep.mubr.f32.mxu1 %v1125_v19 }
 0x46f   :  { %v1048_v24 = vpop.f32.mrb[55].mxu0 }
 0x470   :  { %v1126_v25 = vand.u32 2147483647, %v1048_v24 }
 0x472   :  { %v2177_v26 = vpop.f32.mrb[56].mxu0  ;;  %1712 = vmatmul.mubr.f32.gmra.mrb[50].mxu1 %v1126_v25 }
 0x473   :  { %v1054_v27 = vpop.f32.mrb[57].mxu0 }
 0x474   :  { %v1127_v30 = vand.u32 2147483647, %v1054_v27 }
 0x476   :  { %v1058_v31 = vpop.f32.mrb[58].mxu0  ;;  %1714 = vmatprep.mubr.f32.mxu1 %v1127_v30 }
 0x477   :  { %v1060_v34 = vpop.f32.mrb[59].mxu0 }
 0x478   :  { %v1128_v36 = vand.u32 2147483647, %v1060_v34 }
 0x47a   :  { %v1064_v20 = vpop.f32.mrb[60].mxu0  ;;  %1715 = vmatmul.mubr.f32.gmra.mrb[52].mxu1 %v1128_v36 }
 0x47b   :  { %v1066_v41 = vpop.f32.mrb[61].mxu0 }
 0x47c   :  { %v1129_v29 = vand.u32 2147483647, %v1066_v41 }
 0x47e   :  { %v1070_v44 = vpop.f32.mrb[62].mxu0  ;;  %1717 = vmatprep.mubr.f32.mxu1 %v1129_v29 }
 0x47f   :  { %v1072_v46 = vpop.f32.mrb[63].mxu0 }
 0x480   :  { %v1130_v0 = vand.u32 2147483647, %v1072_v46 }
 0x482   :  { %v1076_v61 = vpop.f32.mrb[64].mxu0  ;;  %1718 = vmatmul.mubr.f32.gmra.mrb[54].mxu1 %v1130_v0 }
 0x483   :  { %v1078_v48 = vpop.f32.mrb[65].mxu0 }
 0x484   :  { %v1131_v10 = vand.u32 2147483647, %v1078_v48 }
 0x486   :  { %v1082_v50 = vpop.f32.mrb[66].mxu0  ;;  %1720 = vmatprep.mubr.f32.mxu1 %v1131_v10 }
 0x487   :  { %v1084_v5 = vpop.f32.mrb[67].mxu0 }
 0x488   :  { %v1132_v54 = vand.u32 2147483647, %v1084_v5 }
 0x48a   :  { %v1088_v23 = vpop.f32.mrb[68].mxu0  ;;  %1721 = vmatmul.mubr.f32.gmra.mrb[56].mxu1 %v1132_v54 }
 0x48b   :  { %v1090_v56 = vpop.f32.mrb[69].mxu0 }
 0x48c   :  { %v1133_v15 = vand.u32 2147483647, %v1090_v56 }
 0x48e   :  { %v1094_v60 = vpop.f32.mrb[70].mxu0  ;;  %1723 = vmatprep.mubr.f32.mxu1 %v1133_v15 }
 0x48f   :  { %v1096_v38 = vpop.f32.mrb[71].mxu0 }
 0x490   :  { %v1134_v62 = vand.u32 2147483647, %v1096_v38 }
 0x492   :  { %v1100_v28 = vpop.f32.mrb[72].mxu0  ;;  %1724 = vmatmul.mubr.f32.gmra.mrb[58].mxu1 %v1134_v62 }
 0x493   :  { %v1102_v1 = vpop.f32.mrb[73].mxu0 }
 0x494   :  { %v1135_v52 = vand.u32 2147483647, %v1102_v1 }
 0x496   :  { %v1106_v2 = vpop.f32.mrb[74].mxu0  ;;  %1726 = vmatprep.mubr.f32.mxu1 %v1135_v52 }
 0x497   :  { %v1108_v39 = vpop.f32.mrb[75].mxu0 }
 0x498   :  { %v1136_v4 = vand.u32 2147483647, %v1108_v39 }
 0x49a   :  { %v1112_v63 = vpop.f32.mrb[76].mxu0  ;;  %1727 = vmatmul.mubr.f32.gmra.mrb[60].mxu1 %v1136_v4 }
 0x49b   :  { %v1114_v6 = vpop.f32.mrb[77].mxu0 }
 0x49c   :  { %v1137_v58 = vand.u32 2147483647, %v1114_v6 }
 0x49e   :  { %v1118_v8 = vpop.f32.mrb[78].mxu0  ;;  %1729 = vmatprep.mubr.f32.mxu1 %v1137_v58 }
 0x49f   :  { %v1120_v7 = vpop.f32.mrb[79].mxu0 }
 0x4a0   :  { %v1138_v3 = vand.u32 2147483647, %v1120_v7 }
 0x4a2   :  { %1730 = vmatmul.mubr.f32.gmra.mrb[62].mxu1 %v1138_v3 }
 0x53d   :  { %v1710_v12 = vpop.f32.mrb[48].mxu1 }
 0x53e   :  { %v1318_v13 = vadd.f32 %v1710_v12, %v1034_v14  ;;  %v1238_v16 = vpop.f32.mrb[49].mxu1 }
 0x53f   :  { %v1317_v17 = vadd.f32 %v1238_v16, %v2173_v9 }
 0x540   :  { %1343 = vperm.xlu0 %1741, %v1318_v13  }
 0x544   :  { %1338 = vperm.xlu0 %1741, %v1317_v17  }
 0x545   :  { %v1713_v11 = vpop.f32.mrb[50].mxu1 }
 0x546   :  { %v1320_v19 = vadd.f32 %v1713_v11, %v1046_v21  ;;  %v1248_v24 = vpop.f32.mrb[51].mxu1 }
 0x547   :  { %v1319_v25 = vadd.f32 %v1248_v24, %v2175_v18 }
 0x548   :  { %1353 = vperm.xlu1 %1742, %v1320_v19  }
 0x54c   :  { %1348 = vperm.xlu1 %1742, %v1319_v25  }
 0x54d   :  { %v1716_v27 = vpop.f32.mrb[52].mxu1 }
 0x54e   :  { %v1322_v30 = vadd.f32 %v1716_v27, %v1058_v31  ;;  %v1258_v34 = vpop.f32.mrb[53].mxu1 }
 0x54f   :  { %v1321_v36 = vadd.f32 %v1258_v34, %v2177_v26 }
 0x550   :  { %1363 = vperm.xlu1 %1742, %v1322_v30  }
 0x551   :  { %1358 = vperm.xlu0 %1741, %v1321_v36  }
 0x555   :  { %v1719_v14 = vpop.f32.mrb[54].mxu1 }
 0x556   :  { %v1324_v41 = vadd.f32 %v1719_v14, %v1070_v44  ;;  %v1268_v29 = vpop.f32.mrb[55].mxu1 }
 0x557   :  { %v1323_v9 = vadd.f32 %v1268_v29, %v1064_v20 }
 0x558   :  { %1373 = vperm.xlu1 %1742, %v1324_v41  }
 0x559   :  { %1368 = vperm.xlu0 %1741, %v1323_v9  }
 0x55d   :  { %v1722_v46 = vpop.f32.mrb[56].mxu1 }
 0x55e   :  { %v1326_v21 = vadd.f32 %v1722_v46, %v1082_v50  ;;  %v1278_v0 = vpop.f32.mrb[57].mxu1 }
 0x55f   :  { %v1325_v48 = vadd.f32 %v1278_v0, %v1076_v61  ;;  %v1333_v61 = vlaneseq }
 0x560   :  { %1383 = vperm.xlu1 %1742, %v1326_v21  }
 0x561   :  { %1378 = vperm.xlu0 %1741, %v1325_v48   ;;  %v1334_v62 = vand.u32 127, %v1333_v61 }
 0x563   :  { %vm1335_vm1 = vcmp.eq.s32.totalorder %v1334_v62, 127 }
 0x565   :  { %v1725_v18 = vpop.f32.mrb[58].mxu1 }
 0x566   :  { %v1328_v10 = vadd.f32 %v1725_v18, %v1094_v60  ;;  %v1288_v31 = vpop.f32.mrb[59].mxu1 }
 0x567   :  { %v1327_v5 = vadd.f32 %v1288_v31, %v1088_v23 }
 0x568   :  { %1393 = vperm.xlu1 %1742, %v1328_v10  }
 0x569   :  { %1388 = vperm.xlu0 %1741, %v1327_v5  }
 0x56d   :  { %v1728_v26 = vpop.f32.mrb[60].mxu1 }
 0x56e   :  { %v1330_v54 = vadd.f32 %v1728_v26, %v1106_v2  ;;  %v1298_v56 = vpop.f32.mrb[61].mxu1 }
 0x56f   :  { %v1329_v44 = vadd.f32 %v1298_v56, %v1100_v28 }
 0x570   :  { %1403 = vperm.xlu1 %1742, %v1330_v54  }
 0x571   :  { %1398 = vperm.xlu0 %1741, %v1329_v44  }
 0x575   :  { %v1731_v20 = vpop.f32.mrb[62].mxu1 }
 0x576   :  { %v1332_v15 = vadd.f32 %v1731_v20, %v1118_v8  ;;  %v1308_v38 = vpop.f32.mrb[63].mxu1 }
 0x577   :  { %v1331_v50 = vadd.f32 %v1308_v38, %v1112_v63 }
 0x578   :  { %1413 = vperm.xlu1 %1742, %v1332_v15  }
 0x579   :  { %1408 = vperm.xlu0 %1741, %v1331_v50  }
 0x5bf   :  { %v1344_v60 = vpop.permute.xlu0 %1343 }
 0x5c0   :  { %v1417_v23 = vsel %vm1335_vm1, %v1344_v60, %v2031_v32 }
 0x5c1   :  { %1433 = vst [vmem:[#allocation7 + $0x8] sm:$0xff] %v1417_v23 }
 0x5c3   :  { %v1339_v1 = vpop.permute.xlu0 %1338 }
 0x5c4   :  { %v1416_v28 = vsel %vm1335_vm1, %v1339_v1, %v2034_v35 }
 0x5c5   :  { %1432 = vst [vmem:[#allocation7] sm:$0xff] %v1416_v28 }
 0x5c7   :  { %v1354_v52 = vpop.permute.xlu1 %1353 }
 0x5c8   :  { %v1419_v2 = vsel %vm1335_vm1, %v1354_v52, %v2040_v37 }
 0x5c9   :  { %1435 = vst [vmem:[#allocation7 + $0x18] sm:$0xff] %v1419_v2 }
 0x5cb   :  { %v1349_v39 = vpop.permute.xlu1 %1348 }
 0x5cc   :  { %v1418_v4 = vsel %vm1335_vm1, %v1349_v39, %v2044_v22 }
 0x5cd   :  { %1434 = vst [vmem:[#allocation7 + $0x10] sm:$0xff] %v1418_v4 }
 0x5cf   :  { %v1364_v63 = vpop.permute.xlu1 %1363 }
 0x5d0   :  { %v1421_v32 = vsel %vm1335_vm1, %v1364_v63, %v2050_v40  ;;  %v1359_v6 = vpop.permute.xlu0 %1358 }
 0x5d1   :  { %1437 = vst [vmem:[#allocation7 + $0x28] sm:$0xff] %v1421_v32  ;;  %v1420_v35 = vsel %vm1335_vm1, %v1359_v6, %v2054_v33 }
 0x5d2   :  { %1436 = vst [vmem:[#allocation7 + $0x20] sm:$0xff] %v1420_v35 }
 0x5d7   :  { %v1374_v58 = vpop.permute.xlu1 %1373 }
 0x5d8   :  { %v1423_v37 = vsel %vm1335_vm1, %v1374_v58, %v2060_v42  ;;  %v1369_v8 = vpop.permute.xlu0 %1368 }
 0x5d9   :  { %1439 = vst [vmem:[#allocation7 + $0x38] sm:$0xff] %v1423_v37  ;;  %v1422_v22 = vsel %vm1335_vm1, %v1369_v8, %v2064_v43 }
 0x5da   :  { %1438 = vst [vmem:[#allocation7 + $0x30] sm:$0xff] %v1422_v22 }
 0x5df   :  { %v1384_v7 = vpop.permute.xlu1 %1383 }
 0x5e0   :  { %v1425_v40 = vsel %vm1335_vm1, %v1384_v7, %v2070_v45  ;;  %v1379_v3 = vpop.permute.xlu0 %1378 }
 0x5e1   :  { %1441 = vst [vmem:[#allocation7 + $0x48] sm:$0xff] %v1425_v40  ;;  %v1424_v33 = vsel %vm1335_vm1, %v1379_v3, %v2074_v47 }
 0x5e2   :  { %1440 = vst [vmem:[#allocation7 + $0x40] sm:$0xff] %v1424_v33 }
 0x5e7   :  { %v1394_v12 = vpop.permute.xlu1 %1393 }
 0x5e8   :  { %v1427_v42 = vsel %vm1335_vm1, %v1394_v12, %v2080_v49  ;;  %v1389_v13 = vpop.permute.xlu0 %1388 }
 0x5e9   :  { %1443 = vst [vmem:[#allocation7 + $0x58] sm:$0xff] %v1427_v42  ;;  %v1426_v43 = vsel %vm1335_vm1, %v1389_v13, %v2084_v51 }
 0x5ea   :  { %1442 = vst [vmem:[#allocation7 + $0x50] sm:$0xff] %v1426_v43 }
 0x5ef   :  { %v1404_v16 = vpop.permute.xlu1 %1403 }
 0x5f0   :  { %v1429_v45 = vsel %vm1335_vm1, %v1404_v16, %v2090_v53  ;;  %v1399_v17 = vpop.permute.xlu0 %1398 }
 0x5f1   :  { %1445 = vst [vmem:[#allocation7 + $0x68] sm:$0xff] %v1429_v45  ;;  %v1428_v47 = vsel %vm1335_vm1, %v1399_v17, %v2094_v55 }
 0x5f2   :  { %1444 = vst [vmem:[#allocation7 + $0x60] sm:$0xff] %v1428_v47 }
 0x5f7   :  { %v1414_v11 = vpop.permute.xlu1 %1413 }
 0x5f8   :  { %v1431_v49 = vsel %vm1335_vm1, %v1414_v11, %v2100_v57  ;;  %v1409_v19 = vpop.permute.xlu0 %1408 }
 0x5f9   :  { %1447 = vst [vmem:[#allocation7 + $0x78] sm:$0xff] %v1431_v49  ;;  %v1430_v51 = vsel %vm1335_vm1, %v1409_v19, %v2104_v59 }
 0x5fa   :  { %1446 = vst [vmem:[#allocation7 + $0x70] sm:$0xff] %v1430_v51 }
 0x5fb   :  { %1881 = shalt.err (!%p1878_p6)
}
 0x5fc   :  { %s1882_s13 = scalar_lea.hbm %s2233_s4, 2048 }
 0x5fd   :  { %p1883_p7 = scmp.ne.s32.totalorder %s2233_s4, %s1882_s13  ;;  %p1886_p8 = scmp.lt.u32.totalorder %s1882_s13, %s2233_s4 }
 0x5ff   :  { %p1888_p9 = pnand %p1886_p8, %p1883_p7 }
 0x601   :  { %1891 = shalt.err (!%p1888_p9)
}
 0x602   :  { %1459 = dma.vmem_to_hbm [thread:$0]  %s1454_s10, 2048, %s2233_s4, [#allocation4], %s1899_s25, %s1899_s25, %s1900_s26  }
 0x603   :  { %1896 = dma.done.wait [#allocation4], 2048  }
 0x604   :  { %1897 = vsyncadd [#allocation4], 4294965248 }
 0x605   :  { %1463 = vsyncpa [#allocation3], 1 }
 0x606   :  { %1464 = vsyncpa [#allocation6], 1 }
 0x607   :  { %1465 = vsyncpa [#allocation4], 1 }

</bundles_post_ra>
